<compile_context>
chip_gen: v7x
topology: tpu7x:2x2x1
jax: 0.10.0
libtpu: 0.0.40
codegen_flags: <defaults>
</compile_context>

<pallas_src>
import math

import jax
import jax.numpy as jnp
from jax.experimental import pallas as pl
from jax.experimental.pallas import tpu as pltpu

LANE = 128      # hidden/output feature dims are zero-padded to this lane width
SUBLANE = 8     # f32 sublane count: batch tiles are multiples of this


def _round_up(n, m):
    return ((n + m - 1) // m) * m


# ----------------------------------------------------------------------------
# Single fused kernel body: the entire dnn_3l eval forward for one batch tile.
#   x_ref : (TB, F_in)  bf16   (feature dim unpadded)
#   w1    : (F_in, H1P) bf16   b1: (1, H1P) f32
#   w2    : (H1P, H2P)  bf16   b2: (1, H2P) f32
#   w3    : (H2P, OP)   bf16   b3: (1, OP)  f32   (OP = 128-padded output width)
#   o_ref : (TB, D)     f32    D = OP (lane-dense) or out_size (narrow writeback)
# ----------------------------------------------------------------------------
def _dnn3l_fused_kernel(x_ref, w1_ref, b1_ref, w2_ref, b2_ref, w3_ref, b3_ref,
                        o_ref):
    # fc1: Linear -> bias -> ReLU      (BN1 already folded into W2/b2)
    h = jnp.dot(x_ref[...], w1_ref[...], preferred_element_type=jnp.float32)
    h = jnp.maximum(h + b1_ref[...], 0.0)
    # fc2: Linear -> bias -> ReLU      (BN2 already folded into W3/b3)
    h = jnp.dot(h.astype(w2_ref.dtype), w2_ref[...],
                preferred_element_type=jnp.float32)
    h = jnp.maximum(h + b2_ref[...], 0.0)
    # fc3: Linear.  o_ref may be narrower than the padded matmul width; slice
    # out the real columns (identity slice on the lane-dense path).
    y = jnp.dot(h.astype(w3_ref.dtype), w3_ref[...],
                preferred_element_type=jnp.float32) + b3_ref[...]
    o_ref[...] = y[:, :o_ref.shape[1]].astype(o_ref.dtype)


def dnn3l_forward_pallas(x, kp, *, tile_batch=1024):
    """x: (B, input_size) float32.  kp: folded/padded params from fold_and_pad_params."""
    B, fin = x.shape
    assert fin == kp["w1"].shape[0], "input feature dim mismatch"
    out_size = kp["out_size"]
    out_pad = kp["w3"].shape[1]

    # Batch tiling: pad B to a multiple of the tile.  Padded rows are zeros and
    # are sliced off afterwards (rows are independent, so padding is inert).
    bp = _round_up(max(B, SUBLANE), SUBLANE)
    if bp <= tile_batch:
        tb, n_tiles = bp, 1
    else:
        tb = _round_up(tile_batch, SUBLANE)
        bp = _round_up(bp, tb)
        n_tiles = bp // tb

    # Single-tile (tiny) batch: lane-dense 128-wide output store (unmasked vst).
    # Multi-tile batch: narrow out_size-wide output (masked store, ~128x less
    # HBM writeback, which is what dominates at large B).
    dout = out_pad if n_tiles == 1 else out_size

    wdt = kp["w1"].dtype
    xp = jnp.zeros((bp, fin), wdt).at[:B].set(x.astype(wdt))

    def _resident(arr):
        # Same block index every grid step -> fetched once, stays in VMEM.
        return pl.BlockSpec(arr.shape, lambda i: (0, 0))

    out_p = pl.pallas_call(
        _dnn3l_fused_kernel,
        out_shape=jax.ShapeDtypeStruct((bp, dout), jnp.float32),
        grid_spec=pltpu.PrefetchScalarGridSpec(
            num_scalar_prefetch=0,
            grid=(n_tiles,),
            in_specs=[
                pl.BlockSpec((tb, fin), lambda i: (i, 0)),   # streamed batch tile
                _resident(kp["w1"]), _resident(kp["b1"]),
                _resident(kp["w2"]), _resident(kp["b2"]),
                _resident(kp["w3"]), _resident(kp["b3"]),
            ],
            out_specs=pl.BlockSpec((tb, dout), lambda i: (i, 0)),
        ),
        compiler_params=pltpu.CompilerParams(
            dimension_semantics=("parallel",)),
    )(xp, kp["w1"], kp["b1"], kp["w2"], kp["b2"], kp["w3"], kp["b3"])

    return out_p[:B, :out_size]


# ----------------------------------------------------------------------------
# Parameter construction (mirrors dnn_3l.__init__: xavier_uniform Linear
# weights, default PyTorch Linear bias init).  BatchNorm eval statistics /
# affine are drawn non-trivially so the folding path is genuinely tested.
# ----------------------------------------------------------------------------
def _xavier_uniform(key, fan_in, fan_out):
    bound = math.sqrt(6.0 / (fan_in + fan_out))
    # stored as (in, out): transpose of PyTorch's (out, in) Linear weight
    return jax.random.uniform(key, (fan_in, fan_out), jnp.float32, -bound, bound)


def make_dnn3l_raw_params(key, input_size, n_l1, n_l2, output_size=1, eps=1e-5):
    dims = [(input_size, n_l1), (n_l1, n_l2), (n_l2, output_size)]
    layers = []
    for fi, fo in dims:
        key, kw, kb = jax.random.split(key, 3)
        w = _xavier_uniform(kw, fi, fo)
        b_bound = 1.0 / math.sqrt(fi)
        b = jax.random.uniform(kb, (fo,), jnp.float32, -b_bound, b_bound)
        layers.append({"w": w, "b": b})
    # BatchNorm1d eval-mode affine for fc1 / fc2 (non-default stats on purpose).
    for i, width in enumerate((n_l1, n_l2)):
        key, kg, kbt, km, kv = jax.random.split(key, 5)
        gamma = jax.random.uniform(kg, (width,), jnp.float32, 0.5, 1.5)
        beta = jax.random.uniform(kbt, (width,), jnp.float32, -0.5, 0.5)
        running_mean = jax.random.uniform(km, (width,), jnp.float32, -0.5, 0.5)
        running_var = jax.random.uniform(kv, (width,), jnp.float32, 0.5, 2.0)
        scale = gamma / jnp.sqrt(running_var + eps)
        shift = beta - running_mean * scale
        layers[i]["scale"] = scale
        layers[i]["shift"] = shift
    return layers


def fold_and_pad_params(raw, output_size, param_dtype=jnp.bfloat16):
    """Fold post-ReLU BatchNorm affines into the FOLLOWING Linear and zero-pad
    hidden/output dims to 128 lanes.  Weights cast to bf16 (HBM/VMEM traffic,
    bf16 MXU); biases stay f32 (bias+ReLU runs in f32 on the VPU)."""
    l1, l2, l3 = raw
    w1f, b1f = l1["w"], l1["b"]
    w2f = l1["scale"][:, None] * l2["w"]
    b2f = l2["b"] + l1["shift"] @ l2["w"]
    w3f = l2["scale"][:, None] * l3["w"]
    b3f = l3["b"] + l2["shift"] @ l3["w"]

    def pad_w(w, pad_in):
        fi, fo = w.shape
        fi_p = _round_up(fi, LANE) if pad_in else fi   # W1 input dim stays unpadded
        z = jnp.zeros((fi_p, _round_up(fo, LANE)), jnp.float32)
        return z.at[:fi, :fo].set(w).astype(param_dtype)

    def pad_b(b):
        fo = b.shape[0]
        # zero-padding is load-bearing: padded lanes must stay exactly 0 so they
        # contribute nothing downstream and the output slice stays clean.
        return jnp.zeros((1, _round_up(fo, LANE)), jnp.float32).at[0, :fo].set(b)

    return {
        "w1": pad_w(w1f, pad_in=False), "b1": pad_b(b1f),
        "w2": pad_w(w2f, pad_in=True), "b2": pad_b(b2f),
        "w3": pad_w(w3f, pad_in=True), "b3": pad_b(b3f),
        "out_size": output_size,
    }


# ----------------------------------------------------------------------------
# References.
# ----------------------------------------------------------------------------
def dnn3l_forward_ref(x, raw):
    """Exact f32 eval-mode math of the PyTorch module:
    per layer  Dropout(identity) -> Linear -> ReLU -> BatchNorm1d(running stats);
    final layer Dropout(identity) -> Linear."""
    hi = jax.lax.Precision.HIGHEST
    l1, l2, l3 = raw
    h = jnp.maximum(jnp.dot(x, l1["w"], precision=hi) + l1["b"], 0.0)
    h = h * l1["scale"] + l1["shift"]
    h = jnp.maximum(jnp.dot(h, l2["w"], precision=hi) + l2["b"], 0.0)
    h = h * l2["scale"] + l2["shift"]
    return jnp.dot(h, l3["w"], precision=hi) + l3["b"]


def dnn3l_forward_qref(x, kp):
    """jnp emulation of the kernel's exact numerics (bf16 operands, f32 accum)."""
    hi = jax.lax.Precision.HIGHEST
    f32, bf16 = jnp.float32, jnp.bfloat16
    h = jnp.dot(x.astype(bf16).astype(f32), kp["w1"].astype(f32), precision=hi)
    h = jnp.maximum(h + kp["b1"][0], 0.0)
    h = jnp.dot(h.astype(bf16).astype(f32), kp["w2"].astype(f32), precision=hi)
    h = jnp.maximum(h + kp["b2"][0], 0.0)
    y = jnp.dot(h.astype(bf16).astype(f32), kp["w3"].astype(f32), precision=hi)
    return (y + kp["b3"][0])[:, :kp["out_size"]]


if __name__ == "__main__":
    # dnn_3l(input_size=32, n_l1=64, n_l2=48, dropout=0.3, output_size=1), eval mode.
    # TODO(synk): training-mode Dropout masks and BatchNorm batch-stat updates are
    # not implemented; this kernel is the inference (eval) forward pass.
    key = jax.random.PRNGKey(0)
    input_size, n_l1, n_l2, output_size = 32, 64, 48, 1

    key, k_par, k_small, k_big = jax.random.split(key, 4)
    raw_params = make_dnn3l_raw_params(k_par, input_size, n_l1, n_l2, output_size)
    kparams = fold_and_pad_params(raw_params, output_size)

    def check(x, out, tag):
        ref = dnn3l_forward_ref(x, raw_params)          # exact module math, f32
        qref = dnn3l_forward_qref(x, kparams)           # kernel numerics emulated
        assert out.shape == ref.shape, f"{tag}: bad output shape {out.shape}"
        assert jnp.allclose(out, qref, atol=1e-2, rtol=1e-2), \
            f"{tag}: mismatch vs bf16-emulated reference"
        assert jnp.allclose(out, ref, atol=1e-1, rtol=5e-2), \
            f"{tag}: mismatch vs f32 module reference"

    # Small batch: single tile -> lane-dense (unmasked) output store.
    x_small = jax.random.normal(k_small, (8, input_size), jnp.float32)
    out_small = jax.block_until_ready(dnn3l_forward_pallas(x_small, kparams))
    check(x_small, out_small, "small-batch")

    # Larger batch: 3-step pipelined batch grid (parallel axis) + narrow output.
    x_big = jax.random.normal(k_big, (600, input_size), jnp.float32)
    out_big = jax.block_until_ready(
        dnn3l_forward_pallas(x_big, kparams, tile_batch=256))
    check(x_big, out_big, "large-batch")

    print("KERNEL_OK")
</pallas_src>

<mosaic_0001>
module attributes {stable_mosaic.version = 11 : i64} {
  func.func @_dnn3l_fused_kernel(%arg0: i32, %arg1: memref<8x32xbf16, #tpu.memory_space<vmem>>, %arg2: memref<32x128xbf16, #tpu.memory_space<vmem>>, %arg3: memref<1x128xf32, #tpu.memory_space<vmem>>, %arg4: memref<128x128xbf16, #tpu.memory_space<vmem>>, %arg5: memref<1x128xf32, #tpu.memory_space<vmem>>, %arg6: memref<128x128xbf16, #tpu.memory_space<vmem>>, %arg7: memref<1x128xf32, #tpu.memory_space<vmem>>, %arg8: memref<8x128xf32, #tpu.memory_space<vmem>>) attributes {dimension_semantics = [#tpu.dimension_semantics<parallel>], iteration_bounds = array<i64: 1>, scalar_prefetch = 0 : i64, scratch_operands = 0 : i64, tpu.core_type = #tpu.core_type<tc>, window_params = [{transform_indices = @transform_0, window_bounds = array<i64: 8, 32>}, {pipeline_mode = #tpu.pipeline_mode<synchronous>, transform_indices = @transform_1, window_bounds = array<i64: 32, 128>}, {pipeline_mode = #tpu.pipeline_mode<synchronous>, transform_indices = @transform_2, window_bounds = array<i64: 1, 128>}, {pipeline_mode = #tpu.pipeline_mode<synchronous>, transform_indices = @transform_3, window_bounds = array<i64: 128, 128>}, {pipeline_mode = #tpu.pipeline_mode<synchronous>, transform_indices = @transform_4, window_bounds = array<i64: 1, 128>}, {pipeline_mode = #tpu.pipeline_mode<synchronous>, transform_indices = @transform_5, window_bounds = array<i64: 128, 128>}, {pipeline_mode = #tpu.pipeline_mode<synchronous>, transform_indices = @transform_6, window_bounds = array<i64: 1, 128>}, {transform_indices = @transform_7, window_bounds = array<i64: 8, 128>}]} {
    %c0 = arith.constant 0 : index
    %c0_0 = arith.constant 0 : index
    %0 = vector.load %arg1[%c0, %c0_0] : memref<8x32xbf16, #tpu.memory_space<vmem>>, vector<8x32xbf16>
    %c0_1 = arith.constant 0 : index
    %c0_2 = arith.constant 0 : index
    %1 = vector.load %arg2[%c0_1, %c0_2] : memref<32x128xbf16, #tpu.memory_space<vmem>>, vector<32x128xbf16>
    %cst = arith.constant dense<0.000000e+00> : vector<8x128xf32>
    %2 = tpu.matmul %0, %1, %cst {dimension_numbers = #tpu.dot_dimension_numbers<[1], [0], [0], [1], [0, 0, 1, 1], [], []>} : vector<8x32xbf16>, vector<32x128xbf16>, vector<8x128xf32> -> vector<8x128xf32>
    %c0_3 = arith.constant 0 : index
    %c0_4 = arith.constant 0 : index
    %3 = vector.load %arg3[%c0_3, %c0_4] : memref<1x128xf32, #tpu.memory_space<vmem>>, vector<1x128xf32>
    %4 = vector.broadcast %3 : vector<1x128xf32> to vector<8x128xf32>
    %5 = arith.addf %2, %4 : vector<8x128xf32>
    %cst_5 = arith.constant 0.000000e+00 : f32
    %6 = vector.broadcast %cst_5 : f32 to vector<8x128xf32>
    %7 = arith.maximumf %5, %6 : vector<8x128xf32>
    %8 = arith.truncf %7 : vector<8x128xf32> to vector<8x128xbf16>
    %c0_6 = arith.constant 0 : index
    %c0_7 = arith.constant 0 : index
    %9 = vector.load %arg4[%c0_6, %c0_7] : memref<128x128xbf16, #tpu.memory_space<vmem>>, vector<128x128xbf16>
    %cst_8 = arith.constant dense<0.000000e+00> : vector<8x128xf32>
    %10 = tpu.matmul %8, %9, %cst_8 {dimension_numbers = #tpu.dot_dimension_numbers<[1], [0], [0], [1], [0, 0, 1, 1], [], []>} : vector<8x128xbf16>, vector<128x128xbf16>, vector<8x128xf32> -> vector<8x128xf32>
    %c0_9 = arith.constant 0 : index
    %c0_10 = arith.constant 0 : index
    %11 = vector.load %arg5[%c0_9, %c0_10] : memref<1x128xf32, #tpu.memory_space<vmem>>, vector<1x128xf32>
    %12 = vector.broadcast %11 : vector<1x128xf32> to vector<8x128xf32>
    %13 = arith.addf %10, %12 : vector<8x128xf32>
    %cst_11 = arith.constant 0.000000e+00 : f32
    %14 = vector.broadcast %cst_11 : f32 to vector<8x128xf32>
    %15 = arith.maximumf %13, %14 : vector<8x128xf32>
    %16 = arith.truncf %15 : vector<8x128xf32> to vector<8x128xbf16>
    %c0_12 = arith.constant 0 : index
    %c0_13 = arith.constant 0 : index
    %17 = vector.load %arg6[%c0_12, %c0_13] : memref<128x128xbf16, #tpu.memory_space<vmem>>, vector<128x128xbf16>
    %cst_14 = arith.constant dense<0.000000e+00> : vector<8x128xf32>
    %18 = tpu.matmul %16, %17, %cst_14 {dimension_numbers = #tpu.dot_dimension_numbers<[1], [0], [0], [1], [0, 0, 1, 1], [], []>} : vector<8x128xbf16>, vector<128x128xbf16>, vector<8x128xf32> -> vector<8x128xf32>
    %c0_15 = arith.constant 0 : index
    %c0_16 = arith.constant 0 : index
    %19 = vector.load %arg7[%c0_15, %c0_16] : memref<1x128xf32, #tpu.memory_space<vmem>>, vector<1x128xf32>
    %20 = vector.broadcast %19 : vector<1x128xf32> to vector<8x128xf32>
    %21 = arith.addf %18, %20 : vector<8x128xf32>
    %c0_17 = arith.constant 0 : index
    %c0_18 = arith.constant 0 : index
    %22 = vector.load %arg8[%c0_17, %c0_18] : memref<8x128xf32, #tpu.memory_space<vmem>>, vector<8x128xf32>
    tpu.vector_store %arg8[%c0_17, %c0_18], %21 {strides = array<i32>} : memref<8x128xf32, #tpu.memory_space<vmem>>, vector<8x128xf32>,
    return
  }
  func.func @transform_0(%arg0: i32) -> (i32, i32) {
    %c0_i32 = arith.constant 0 : i32
    %c0_i32_0 = arith.constant 0 : i32
    return %arg0, %c0_i32 : i32, i32
  }
  func.func @transform_1(%arg0: i32) -> (i32, i32) {
    %c0_i32 = arith.constant 0 : i32
    %c0_i32_0 = arith.constant 0 : i32
    %c0_i32_1 = arith.constant 0 : i32
    return %c0_i32, %c0_i32_0 : i32, i32
  }
  func.func @transform_2(%arg0: i32) -> (i32, i32) {
    %c0_i32 = arith.constant 0 : i32
    %c0_i32_0 = arith.constant 0 : i32
    %c0_i32_1 = arith.constant 0 : i32
    return %c0_i32, %c0_i32_0 : i32, i32
  }
  func.func @transform_3(%arg0: i32) -> (i32, i32) {
    %c0_i32 = arith.constant 0 : i32
    %c0_i32_0 = arith.constant 0 : i32
    %c0_i32_1 = arith.constant 0 : i32
    return %c0_i32, %c0_i32_0 : i32, i32
  }
  func.func @transform_4(%arg0: i32) -> (i32, i32) {
    %c0_i32 = arith.constant 0 : i32
    %c0_i32_0 = arith.constant 0 : i32
    %c0_i32_1 = arith.constant 0 : i32
    return %c0_i32, %c0_i32_0 : i32, i32
  }
  func.func @transform_5(%arg0: i32) -> (i32, i32) {
    %c0_i32 = arith.constant 0 : i32
    %c0_i32_0 = arith.constant 0 : i32
    %c0_i32_1 = arith.constant 0 : i32
    return %c0_i32, %c0_i32_0 : i32, i32
  }
  func.func @transform_6(%arg0: i32) -> (i32, i32) {
    %c0_i32 = arith.constant 0 : i32
    %c0_i32_0 = arith.constant 0 : i32
    %c0_i32_1 = arith.constant 0 : i32
    return %c0_i32, %c0_i32_0 : i32, i32
  }
  func.func @transform_7(%arg0: i32) -> (i32, i32) {
    %c0_i32 = arith.constant 0 : i32
    %c0_i32_0 = arith.constant 0 : i32
    return %arg0, %c0_i32 : i32, i32
  }
}

</mosaic_0001>

<bundles_post_ra>
// kernel: tpu_custom_call.1
= control target key start
LH: loop header
LB: loop body
LE: loop exit
PB: predicated region body
PF: predicated region fallthrough
CT: control target
= control target key end

     0   :  { %12 = vsyncpa [#allocation3], 0  ;;  %s780_s0 = inlined_call_operand.hbm [shape: bf16[8,32], index: 0, kind: input, shape index: {}]   ;;  %s781_s1 = inlined_call_operand.hbm [shape: bf16[32,128], index: 1, kind: input, shape index: {}]   ;;  %s782_s2 = inlined_call_operand.vmem [shape: f32[1,128], index: 2, kind: input, shape index: {}]   ;;  %s783_s3 = inlined_call_operand.hbm [shape: bf16[128,128], index: 3, kind: input, shape index: {}]   ;;  %s784_s4 = inlined_call_operand.vmem [shape: f32[1,128], index: 4, kind: input, shape index: {}]   ;;  %s785_s5 = inlined_call_operand.hbm [shape: bf16[128,128], index: 5, kind: input, shape index: {}]   ;;  %s786_s6 = inlined_call_operand.vmem [shape: f32[1,128], index: 6, kind: input, shape index: {}]   ;;  %s787_s7 = inlined_call_operand.hbm [shape: f32[8,128], index: 7, kind: output, shape index: {}]  }
   0x1   :  { %13 = vsyncpa [#allocation6], 0 }
   0x2   :  { %14 = vsyncpa [#allocation9], 0 }
   0x3   :  { %15 = vsyncpa [#allocation4], 0  ;;  %s629_s24 = smov [#allocation5]   ;;  %s511_s28 = scalar_lea.hbm %s781_s1, 256 }
   0x4   :  { %s31_s25 = sshll.u32 %s629_s24, 4  ;;  %p512_p0 = scmp.ne.s32.totalorder %s781_s1, %s511_s28  ;;  %s32_s25 = int_to_ptr.vmem [resolvable:$true] %s31_s25 }
   0x5   :  { %p515_p1 = scmp.lt.u32.totalorder %s511_s28, %s781_s1 }
   0x7   :  { %p517_p2 = pnand %p515_p1, %p512_p0 }
   0x9   :  { %520 = shalt.err (!%p517_p2)
}
   0xa   :  { %s521_s10 = scalar_lea.vmem %s32_s25, 256  ;;  %p526_p4 = scmp.lt.s32.totalorder %s32_s25, %s32_s25 }
   0xb   :  { %p522_p3 = scmp.ne.s32.totalorder %s32_s25, %s521_s10  ;;  %p527_p5 = scmp.lt.s32.totalorder %s521_s10, %s521_s10 }
   0xd   :  { %p528_p6 = por %p527_p5, %p526_p4 }
   0xf   :  { %p529_p7 = pnand %p528_p6, %p522_p3 }
  0x11   :  { %532 = shalt.err (!%p529_p7)
}
  0x12   :  { %s630_s11 = smov 64   ;;  %s631_s12 = smov 4  }
  0x13   :  { %37 = dma.hbm_to_vmem [thread:$0]  %s781_s1, 256, %s32_s25, [#allocation6], %s630_s11, %s630_s11, %s631_s12  }
  0x14   :  { %s632_s15 = smov [#allocation2]   ;;  %s633_s17 = smov [#allocation7]  }
  0x15   :  { %s22_s16 = sshll.u32 %s632_s15, 4  ;;  %s45_s18 = sshll.u32 %s633_s17, 4  ;;  %s23_s16 = int_to_ptr.vmem [resolvable:$true] %s22_s16  ;;  %s46_s18 = int_to_ptr.vmem [resolvable:$true] %s45_s18 }
  0x16   :  { %s533_s21 = scalar_lea.hbm %s780_s0, 64 }
  0x17   :  { %p534_p8 = scmp.ne.s32.totalorder %s780_s0, %s533_s21  ;;  %p537_p9 = scmp.lt.u32.totalorder %s533_s21, %s780_s0 }
  0x19   :  { %p539_p10 = pnand %p537_p9, %p534_p8 }
  0x1b   :  { %542 = shalt.err (!%p539_p10)
}
  0x1c   :  { %s543_s1 = scalar_lea.vmem %s23_s16, 64  ;;  %p548_p12 = scmp.lt.s32.totalorder %s23_s16, %s23_s16 }
  0x1d   :  { %p544_p11 = scmp.ne.s32.totalorder %s23_s16, %s543_s1  ;;  %p549_p13 = scmp.lt.s32.totalorder %s543_s1, %s543_s1 }
  0x1f   :  { %p550_p0 = por %p549_p13, %p548_p12 }
  0x21   :  { %p551_p1 = pnand %p550_p0, %p544_p11 }
  0x23   :  { %554 = shalt.err (!%p551_p1)
}
  0x24   :  { %25 = dma.hbm_to_vmem [thread:$0]  %s780_s0, 64, %s23_s16, [#allocation3]  }
  0x25   :  { %s555_s30 = scalar_lea.hbm %s783_s3, 1024 }
  0x26   :  { %p556_p2 = scmp.ne.s32.totalorder %s783_s3, %s555_s30  ;;  %p559_p3 = scmp.lt.u32.totalorder %s555_s30, %s783_s3 }
  0x28   :  { %p561_p4 = pnand %p559_p3, %p556_p2 }
  0x2a   :  { %564 = shalt.err (!%p561_p4)
}
  0x2b   :  { %s565_s14 = scalar_lea.vmem %s46_s18, 1024  ;;  %p570_p6 = scmp.lt.s32.totalorder %s46_s18, %s46_s18 }
  0x2c   :  { %p566_p5 = scmp.ne.s32.totalorder %s46_s18, %s565_s14  ;;  %p571_p7 = scmp.lt.s32.totalorder %s565_s14, %s565_s14 }
  0x2e   :  { %p572_p8 = por %p571_p7, %p570_p6 }
  0x30   :  { %p573_p9 = pnand %p572_p8, %p566_p5 }
  0x32   :  { %576 = shalt.err (!%p573_p9)
}
  0x33   :  { %51 = dma.hbm_to_vmem [thread:$0]  %s783_s3, 1024, %s46_s18, [#allocation6], %s630_s11, %s630_s11, %s631_s12  }
  0x34   :  { %s634_s16 = smov [#allocation8]   ;;  %s577_s21 = scalar_lea.hbm %s785_s5, 1024 }
  0x35   :  { %s59_s17 = sshll.u32 %s634_s16, 4  ;;  %p578_p10 = scmp.ne.s32.totalorder %s785_s5, %s577_s21  ;;  %s60_s17 = int_to_ptr.vmem [resolvable:$true] %s59_s17 }
  0x36   :  { %p581_p11 = scmp.lt.u32.totalorder %s577_s21, %s785_s5 }
  0x38   :  { %p583_p12 = pnand %p581_p11, %p578_p10 }
  0x3a   :  { %586 = shalt.err (!%p583_p12)
}
  0x3b   :  { %s587_s1 = scalar_lea.vmem %s60_s17, 1024  ;;  %p592_p0 = scmp.lt.s32.totalorder %s60_s17, %s60_s17 }
  0x3c   :  { %p588_p13 = scmp.ne.s32.totalorder %s60_s17, %s587_s1  ;;  %p593_p1 = scmp.lt.s32.totalorder %s587_s1, %s587_s1 }
  0x3e   :  { %p594_p2 = por %p593_p1, %p592_p0 }
  0x40   :  { %p595_p3 = pnand %p594_p2, %p588_p13 }
  0x42   :  { %598 = shalt.err (!%p595_p3)
}
  0x43   :  { %65 = dma.hbm_to_vmem [thread:$0]  %s785_s5, 1024, %s60_s17, [#allocation9], %s630_s11, %s630_s11, %s631_s12  }
  0x44   :  { %621 = dma.done.wait [#allocation3], 64  }
  0x45   :  { %622 = vsyncadd [#allocation3], 4294967232 }
  0x46   :  { %623 = dma.done.wait [#allocation6], 1280  }
  0x47   :  { %624 = vsyncadd [#allocation6], 4294966016 }
  0x48   :  { %625 = dma.done.wait [#allocation9], 1024  }
  0x49   :  { %626 = vsyncadd [#allocation9], 4294966272  ;;  %v635_v0 = vmov 0.0   ;;  %vm636_vm0 = vmmov 0   ;;  %v493_v1 = vld [vmem:[#allocation5] sm:$0xff]   ;;  %v494_v2 = vld [vmem:[#allocation5 + $0x8] sm:$0xff]  }
  0x4a   :  { %436 = vmatprep.subr.bf16.mxu0 %v635_v0  ;;  %440 = vmatprep.mubr.msk.bf16.mxu0 %vm636_vm0, %v635_v0  ;;  %v495_v3 = vld [vmem:[#allocation7] sm:$0xff]   ;;  %vm105_vm1 = vcmask 261120   ;;  %v496_v4 = vld [vmem:[#allocation7 + $0x8] sm:$0xff]   ;;  %v497_v6 = vld [vmem:[#allocation7 + $0x10] sm:$0xff]   ;;  %s637_s28 = smov [#allocation10]  }
  0x4b   :  { %444 = vmatprep.subr.bf16.mxu1 %v635_v0  ;;  %460 = vmatprep.mubr.msk.bf16.mxu1 %vm636_vm0, %v635_v0  ;;  %v81_v5 = vld [vmem:[#allocation2] sm:$0xf]  ;;  %v498_v7 = vld [vmem:[#allocation7 + $0x18] sm:$0xff]   ;;  %v499_v8 = vld [vmem:[#allocation7 + $0x20] sm:$0xff]   ;;  %s382_s29 = sshll.u32 %s637_s28, 4  ;;  %s383_s29 = int_to_ptr.vmem [resolvable:$true] %s382_s29 }
  0x4c   :  { %437 = vmatpush3.bf16.msra.mxu0 %v493_v1  ;;  %445 = vmatpush3.bf16.msra.mxu1 %v495_v3  ;;  %v500_v9 = vld [vmem:[#allocation7 + $0x28] sm:$0xff]   ;;  %v501_v10 = vld [vmem:[#allocation7 + $0x30] sm:$0xff]   ;;  %v502_v11 = vld [vmem:[#allocation7 + $0x38] sm:$0xff]   ;;  %p604_p5 = scmp.lt.s32.totalorder %s383_s29, %s383_s29 }
  0x4d   :  { %438 = vmatprep.subr.bf16.mxu0 %v635_v0  ;;  %446 = vmatprep.subr.bf16.mxu1 %v635_v0  ;;  %v503_v12 = vld [vmem:[#allocation8] sm:$0xff]   ;;  %v504_v13 = vld [vmem:[#allocation8 + $0x8] sm:$0xff]   ;;  %v505_v14 = vld [vmem:[#allocation8 + $0x10] sm:$0xff]  }
  0x4e   :  { %v506_v15 = vld [vmem:[#allocation8 + $0x18] sm:$0xff]   ;;  %v507_v16 = vld [vmem:[#allocation8 + $0x20] sm:$0xff]   ;;  %v508_v17 = vld [vmem:[#allocation8 + $0x28] sm:$0xff]  }
  0x4f   :  { %v393_v18 = vld [vmem:[%s782_s2] ss:$0 sm:$0xff]  ;;  %v509_v26 = vld [vmem:[#allocation8 + $0x30] sm:$0xff]   ;;  %v510_v27 = vld [vmem:[#allocation8 + $0x38] sm:$0xff]  }
  0x50   :  { %439 = vmatpush3.bf16.msra.mxu0 %v494_v2  ;;  %447 = vmatpush3.bf16.msra.mxu1 %v496_v4  ;;  %v397_v28 = vld [vmem:[%s784_s4] ss:$0 sm:$0xff]  ;;  %s599_s4 = scalar_lea.vmem %s383_s29, 128 }
  0x51   :  { %464 = vmatprep.subr.bf16.mxu0 %v635_v0  ;;  %448 = vmatprep.subr.bf16.mxu1 %v635_v0  ;;  %v406_v36 = vld [vmem:[%s786_s6] ss:$0 sm:$0xff]  ;;  %p600_p4 = scmp.ne.s32.totalorder %s383_s29, %s599_s4  ;;  %p605_p6 = scmp.lt.s32.totalorder %s599_s4, %s599_s4 }
  0x53   :  { %441 = vmatmul.mubr.msk.bf16.vlgmr.msra.gmra.mrb[0].mxu0 %vm105_vm1, %v81_v5  ;;  %p606_p7 = por %p605_p6, %p604_p5 }
  0x54   :  { %480 = vmatprep.mubr.msk.bf16.mxu0 %vm636_vm0, %v635_v0  ;;  %449 = vmatpush3.bf16.msra.mxu1 %v497_v6 }
  0x55   :  { %450 = vmatprep.subr.bf16.mxu1 %v635_v0  ;;  %465 = vmatpush3.bf16.msra.mxu0 %v503_v12  ;;  %p607_p8 = pnand %p606_p7, %p600_p4 }
  0x56   :  { %466 = vmatprep.subr.bf16.mxu0 %v635_v0 }
  0x58   :  { %451 = vmatpush3.bf16.msra.mxu1 %v498_v7 }
  0x59   :  { %452 = vmatprep.subr.bf16.mxu1 %v635_v0  ;;  %467 = vmatpush3.bf16.msra.mxu0 %v504_v13 }
  0x5a   :  { %468 = vmatprep.subr.bf16.mxu0 %v635_v0 }
  0x5c   :  { %453 = vmatpush3.bf16.msra.mxu1 %v499_v8 }
  0x5d   :  { %454 = vmatprep.subr.bf16.mxu1 %v635_v0  ;;  %469 = vmatpush3.bf16.msra.mxu0 %v505_v14 }
  0x5e   :  { %470 = vmatprep.subr.bf16.mxu0 %v635_v0 }
  0x60   :  { %455 = vmatpush3.bf16.msra.mxu1 %v500_v9 }
  0x61   :  { %456 = vmatprep.subr.bf16.mxu1 %v635_v0  ;;  %471 = vmatpush3.bf16.msra.mxu0 %v506_v15 }
  0x62   :  { %472 = vmatprep.subr.bf16.mxu0 %v635_v0 }
  0x64   :  { %457 = vmatpush3.bf16.msra.mxu1 %v501_v10 }
  0x65   :  { %458 = vmatprep.subr.bf16.mxu1 %v635_v0  ;;  %473 = vmatpush3.bf16.msra.mxu0 %v507_v16 }
  0x66   :  { %474 = vmatprep.subr.bf16.mxu0 %v635_v0 }
  0x68   :  { %459 = vmatpush3.bf16.msra.mxu1 %v502_v11 }
  0x69   :  { %475 = vmatpush3.bf16.msra.mxu0 %v508_v17 }
  0x6a   :  { %476 = vmatprep.subr.bf16.mxu0 %v635_v0 }
  0x6d   :  { %477 = vmatpush3.bf16.msra.mxu0 %v509_v26 }
  0x6e   :  { %478 = vmatprep.subr.bf16.mxu0 %v635_v0 }
  0x71   :  { %479 = vmatpush3.bf16.msra.mxu0 %v510_v27 }
 0x126   :  { %v143_v19 = vpop.f32.mrb[0].mxu0 }
 0x127   :  { %v144_v20 = vadd.f32 %v393_v18, %v143_v19  ;;  %v442_v21 = vpop.f32.mrb[1].mxu0 }
 0x128   :  { %v146_v22 = vpop.f32.mrb[2].mxu0 }
 0x129   :  { %v149_v23 = vmax.f32 %v144_v20, 0.0  ;;  %v443_v24 = vpop.f32.mrb[3].mxu0 }
 0x12b   :  { %v150_v25 = vpack.c.bf16 %v149_v23, %v149_v23 }
 0x12d   :  { %461 = vmatmul.mubr.bf16.vlgmr.msra.gmra.mrb[0].mxu1 %v150_v25 }
 0x200   :  { %v256_v29 = vpop.f32.mrb[0].mxu1 }
 0x201   :  { %v257_v30 = vadd.f32 %v397_v28, %v256_v29  ;;  %v462_v31 = vpop.f32.mrb[1].mxu1 }
 0x202   :  { %v259_v32 = vpop.f32.mrb[2].mxu1 }
 0x203   :  { %v262_v33 = vmax.f32 %v257_v30, 0.0  ;;  %v463_v34 = vpop.f32.mrb[3].mxu1 }
 0x205   :  { %v263_v35 = vpack.c.bf16 %v262_v33, %v262_v33 }
 0x207   :  { %481 = vmatmul.mubr.bf16.vlgmr.msra.gmra.mrb[4].mxu0 %v263_v35 }
 0x2da   :  { %v369_v37 = vpop.f32.mrb[4].mxu0 }
 0x2db   :  { %v370_v38 = vadd.f32 %v406_v36, %v369_v37  ;;  %v482_v39 = vpop.f32.mrb[5].mxu0 }
 0x2dc   :  { %v372_v40 = vpop.f32.mrb[6].mxu0 }
 0x2dd   :  { %375 = vst [vmem:[#allocation10] sm:$0xff] %v370_v38  ;;  %v483_v41 = vpop.f32.mrb[7].mxu0 }
 0x2de   :  { %610 = shalt.err (!%p607_p8)
}
 0x2df   :  { %s611_s6 = scalar_lea.hbm %s787_s7, 128 }
 0x2e0   :  { %p612_p9 = scmp.ne.s32.totalorder %s787_s7, %s611_s6  ;;  %p615_p10 = scmp.lt.u32.totalorder %s611_s6, %s787_s7 }
 0x2e2   :  { %p617_p11 = pnand %p615_p10, %p612_p9 }
 0x2e4   :  { %620 = shalt.err (!%p617_p11)
}
 0x2e5   :  { %385 = dma.vmem_to_hbm [thread:$0]  %s383_s29, 128, %s787_s7, [#allocation4]  }
 0x2e6   :  { %627 = dma.done.wait [#allocation4], 128  }
 0x2e7   :  { %628 = vsyncadd [#allocation4], 4294967168 }
 0x2e8   :  { %389 = vsyncpa [#allocation3], 1 }
 0x2e9   :  { %390 = vsyncpa [#allocation6], 1 }
 0x2ea   :  { %391 = vsyncpa [#allocation9], 1 }
 0x2eb   :  { %392 = vsyncpa [#allocation4], 1 }

</bundles_post_ra>
